<compile_context>
chip_gen: v7x
topology: tpu7x:2x2x1
jax: 0.10.0
libtpu: 0.0.40
codegen_flags: <defaults>
</compile_context>

<pallas_src>
import jax
import jax.numpy as jnp
from jax import lax
from jax.experimental import pallas as pl
from jax.experimental.pallas import tpu as pltpu


def _residual_linear_kernel_acc(x_ref, w_ref, b_ref, o_ref, acc_ref):
    """General-dtype path (bf16/other outputs): f32 VMEM accumulator,
    single cast + store in the epilogue.

    x_ref:   (tm, tk)  activation tile (doubles as the residual tile at k == j)
    w_ref:   (tn, tk)  weight tile, PyTorch (out, in) layout
    b_ref:   (1,  tn)  bias tile
    o_ref:   (tm, tn)  output tile
    acc_ref: (tm, tn)  f32 accumulator scratch (resident across K)
    Requires tn == tk (enforced by the wrapper) for the fused residual.
    """
    j = pl.program_id(1)
    k = pl.program_id(2)

    @pl.when(k == 0)
    def _init():
        acc_ref[...] = jnp.zeros_like(acc_ref)

    # x @ W^T without transposing W: contract dim 1 of x with dim 1 of W (MXU).
    acc_ref[...] += lax.dot_general(
        x_ref[...], w_ref[...],
        dimension_numbers=(((1,), (1,)), ((), ())),
        preferred_element_type=jnp.float32,
    )

    # Residual fused into the K loop: with tn == tk, the LHS tile at k == j is
    # exactly x[(i, j)] — no second pass over x from HBM.
    @pl.when(k == j)
    def _residual():
        acc_ref[...] += x_ref[...].astype(jnp.float32)

    @pl.when(k == pl.num_programs(2) - 1)
    def _finalize():
        o_ref[...] = (acc_ref[...] + b_ref[...].astype(jnp.float32)).astype(o_ref.dtype)


def _residual_linear_kernel_f32(x_ref, w_ref, b_ref, o_ref):
    """f32-output fast path: the output tile's index_map ignores k, so it is
    resident across the K sweep — accumulate into it directly (no scratch,
    no final acc->o copy)."""
    j = pl.program_id(1)
    k = pl.program_id(2)

    @pl.when(k == 0)
    def _init():
        o_ref[...] = jnp.broadcast_to(b_ref[...].astype(jnp.float32), o_ref.shape)

    o_ref[...] += lax.dot_general(
        x_ref[...], w_ref[...],
        dimension_numbers=(((1,), (1,)), ((), ())),
        preferred_element_type=jnp.float32,
    )

    @pl.when(k == j)
    def _residual():
        o_ref[...] += x_ref[...].astype(jnp.float32)


def _pick_tile(dim, preferred, align):
    """Largest multiple of `align` that divides `dim` and is <= preferred.
    Falls back to the full dimension for small / oddly-shaped problems."""
    if dim <= align:
        return dim
    t = min(preferred, (dim // align) * align)
    while t >= align:
        if dim % t == 0:
            return t
        t -= align
    return dim


def _sublane_align(dtype):
    # f32 -> 8, bf16 -> 16, int8/fp8 -> 32 (sublane packing of sub-32-bit dtypes)
    return {4: 8, 2: 16, 1: 32}.get(jnp.dtype(dtype).itemsize, 8)


def residual_block(x, w, b, *, tm=None, tnk=None, min_parallel_tiles=2,
                   vmem_limit_bytes=None):
    """x: (B, D); w: (D, D) in PyTorch (out_features, in_features) layout; b: (D,)."""
    B, D = x.shape
    assert w.shape == (D, D) and b.shape == (D,)

    if tm is None:
        # tm bounds weight re-reads (B/tm passes over W, the dominant HBM stream).
        tm = _pick_tile(B, 512, _sublane_align(x.dtype))
    if tnk is None:
        # Single tile size for N and K (tn == tk is required by the fused
        # residual); large tiles cut x re-reads and amortize the accumulator
        # read-modify-write across fewer K steps.
        tnk = _pick_tile(D, 512, 128)
        # Keep >= 2 parallel (M, N) tiles for v7x's two TensorCores; split along
        # N so total weight traffic stays 1x (x traffic grows instead, and x is
        # the smaller stream when B <= D).
        if (B // tm) * (D // tnk) < min_parallel_tiles and tnk > 128:
            half = _pick_tile(D, max(128, tnk // 2), 128)
            if half < tnk:
                tnk = half
    assert B % tm == 0 and D % tnk == 0, (tm, tnk, B, D)

    grid = (B // tm, D // tnk, D // tnk)
    b2 = b.reshape(1, D)  # 2-D for TPU lane layout (metadata-only reshape)

    out_dtype = x.dtype
    if out_dtype == jnp.float32:
        kernel = _residual_linear_kernel_f32
        scratch_shapes = ()
    else:
        kernel = _residual_linear_kernel_acc
        scratch_shapes = (pltpu.VMEM((tm, tnk), jnp.float32),)

    if vmem_limit_bytes is None:
        # Double-buffered per-step footprint + headroom, capped well below the
        # v7x 64 MiB physical VMEM (also trivially fits v5e/v6e's 128 MiB).
        in_bytes = jnp.dtype(x.dtype).itemsize
        out_bytes = jnp.dtype(out_dtype).itemsize
        est = (2 * (tm * tnk + tnk * tnk + tnk) * in_bytes   # x, W, bias buffers
               + 2 * tm * tnk * out_bytes                    # output buffers
               + tm * tnk * 4)                               # f32 accumulator
        vmem_limit_bytes = int(min(48 << 20, max(est + (8 << 20), 16 << 20)))

    return pl.pallas_call(
        kernel,
        out_shape=jax.ShapeDtypeStruct((B, D), out_dtype),
        grid_spec=pltpu.PrefetchScalarGridSpec(
            num_scalar_prefetch=0,
            grid=grid,
            in_specs=[
                # x tile: matmul LHS, and the residual tile when k == j
                pl.BlockSpec((tm, tnk), lambda i, j, k: (i, k)),
                # weight tile in (out, in) layout: varies with (j, k)
                pl.BlockSpec((tnk, tnk), lambda i, j, k: (j, k)),
                # bias tile: only depends on the N axis
                pl.BlockSpec((1, tnk), lambda i, j, k: (0, j)),
            ],
            out_specs=pl.BlockSpec((tm, tnk), lambda i, j, k: (i, j)),
            scratch_shapes=scratch_shapes,
        ),
        compiler_params=pltpu.CompilerParams(
            dimension_semantics=("parallel", "parallel", "arbitrary"),
            vmem_limit_bytes=vmem_limit_bytes,
        ),
    )(x, w, b2)


if __name__ == "__main__":
    key = jax.random.PRNGKey(0)
    k_x, k_w, k_b, k_x2, k_w2, k_b2 = jax.random.split(key, 6)

    # Small shapes implied by ResidualBlock(dim): x is (batch, dim).
    B, D = 8, 32
    bound = 1.0 / (D ** 0.5)   # mimics nn.Linear's uniform(-1/sqrt(D), 1/sqrt(D))
    w = jax.random.uniform(k_w, (D, D), jnp.float32, -bound, bound)  # (out, in)
    b = jax.random.uniform(k_b, (D,), jnp.float32, -bound, bound)
    x = jax.random.normal(k_x, (B, D), jnp.float32)

    out = jax.block_until_ready(jax.jit(residual_block)(x, w, b))
    ref = x + x @ w.T + b
    assert out.shape == (B, D)
    assert jnp.allclose(out, ref, atol=1e-5, rtol=1e-5), float(
        jnp.max(jnp.abs(out - ref)))

    # Secondary check: multi-tile (2, 2, 2) grid so the fused k == j residual
    # and the K-resident accumulation/output paths are actually exercised.
    B2, D2 = 64, 256
    bound2 = 1.0 / (D2 ** 0.5)
    w2 = jax.random.uniform(k_w2, (D2, D2), jnp.float32, -bound2, bound2)
    b2 = jax.random.uniform(k_b2, (D2,), jnp.float32, -bound2, bound2)
    x2 = jax.random.normal(k_x2, (B2, D2), jnp.float32)
    out2 = jax.block_until_ready(
        jax.jit(lambda a, ww, bb: residual_block(a, ww, bb, tm=32, tnk=128))(x2, w2, b2))
    ref2 = x2 + x2 @ w2.T + b2
    assert jnp.allclose(out2, ref2, atol=1e-4, rtol=1e-4), float(
        jnp.max(jnp.abs(out2 - ref2)))

    print("KERNEL_OK")
</pallas_src>

<mosaic_0001>
module attributes {stable_mosaic.version = 11 : i64} {
  func.func @_residual_linear_kernel_f32(%arg0: i32, %arg1: i32, %arg2: i32, %arg3: memref<8x32xf32, #tpu.memory_space<vmem>>, %arg4: memref<32x32xf32, #tpu.memory_space<vmem>>, %arg5: memref<1x32xf32, #tpu.memory_space<vmem>>, %arg6: memref<8x32xf32, #tpu.memory_space<vmem>>) attributes {dimension_semantics = [#tpu.dimension_semantics<parallel>, #tpu.dimension_semantics<parallel>, #tpu.dimension_semantics<arbitrary>], iteration_bounds = array<i64: 1, 1, 1>, scalar_prefetch = 0 : i64, scratch_operands = 0 : i64, tpu.core_type = #tpu.core_type<tc>, window_params = [{transform_indices = @transform_0, window_bounds = array<i64: 8, 32>}, {transform_indices = @transform_1, window_bounds = array<i64: 32, 32>}, {transform_indices = @transform_2, window_bounds = array<i64: 1, 32>}, {transform_indices = @transform_3, window_bounds = array<i64: 8, 32>}]} {
    %c0_i32 = arith.constant 0 : i32
    %0 = arith.cmpi eq, %arg2, %c0_i32 : i32
    %1 = arith.extui %0 : i1 to i32
    %c0_i32_0 = arith.constant 0 : i32
    %2 = arith.cmpi ne, %1, %c0_i32_0 : i32
    scf.if %2 {
      %c0_9 = arith.constant 0 : index
      %c0_10 = arith.constant 0 : index
      %12 = vector.load %arg5[%c0_9, %c0_10] : memref<1x32xf32, #tpu.memory_space<vmem>>, vector<1x32xf32>
      %13 = vector.shape_cast %12 : vector<1x32xf32> to vector<1x32xf32>
      %14 = vector.broadcast %13 : vector<1x32xf32> to vector<8x32xf32>
      %c0_11 = arith.constant 0 : index
      %c0_12 = arith.constant 0 : index
      %15 = vector.load %arg6[%c0_11, %c0_12] : memref<8x32xf32, #tpu.memory_space<vmem>>, vector<8x32xf32>
      tpu.vector_store %arg6[%c0_11, %c0_12], %14 {strides = array<i32>} : memref<8x32xf32, #tpu.memory_space<vmem>>, vector<8x32xf32>,
    } else {
    }
    %c0 = arith.constant 0 : index
    %c0_1 = arith.constant 0 : index
    %3 = vector.load %arg6[%c0, %c0_1] : memref<8x32xf32, #tpu.memory_space<vmem>>, vector<8x32xf32>
    %c0_2 = arith.constant 0 : index
    %c0_3 = arith.constant 0 : index
    %4 = vector.load %arg3[%c0_2, %c0_3] : memref<8x32xf32, #tpu.memory_space<vmem>>, vector<8x32xf32>
    %c0_4 = arith.constant 0 : index
    %c0_5 = arith.constant 0 : index
    %5 = vector.load %arg4[%c0_4, %c0_5] : memref<32x32xf32, #tpu.memory_space<vmem>>, vector<32x32xf32>
    %cst = arith.constant dense<0.000000e+00> : vector<8x32xf32>
    %6 = tpu.matmul %4, %5, %cst {dimension_numbers = #tpu.dot_dimension_numbers<[1], [1], [0], [0], [0, 0, 1, 0], [], []>} : vector<8x32xf32>, vector<32x32xf32>, vector<8x32xf32> -> vector<8x32xf32>
    %7 = arith.addf %3, %6 : vector<8x32xf32>
    %c0_6 = arith.constant 0 : index
    %c0_7 = arith.constant 0 : index
    %8 = vector.load %arg6[%c0_6, %c0_7] : memref<8x32xf32, #tpu.memory_space<vmem>>, vector<8x32xf32>
    tpu.vector_store %arg6[%c0_6, %c0_7], %7 {strides = array<i32>} : memref<8x32xf32, #tpu.memory_space<vmem>>, vector<8x32xf32>,
    %9 = arith.cmpi eq, %arg2, %arg1 : i32
    %10 = arith.extui %9 : i1 to i32
    %c0_i32_8 = arith.constant 0 : i32
    %11 = arith.cmpi ne, %10, %c0_i32_8 : i32
    scf.if %11 {
      %c0_9 = arith.constant 0 : index
      %c0_10 = arith.constant 0 : index
      %12 = vector.load %arg6[%c0_9, %c0_10] : memref<8x32xf32, #tpu.memory_space<vmem>>, vector<8x32xf32>
      %c0_11 = arith.constant 0 : index
      %c0_12 = arith.constant 0 : index
      %13 = vector.load %arg3[%c0_11, %c0_12] : memref<8x32xf32, #tpu.memory_space<vmem>>, vector<8x32xf32>
      %14 = arith.addf %12, %13 : vector<8x32xf32>
      %c0_13 = arith.constant 0 : index
      %c0_14 = arith.constant 0 : index
      %15 = vector.load %arg6[%c0_13, %c0_14] : memref<8x32xf32, #tpu.memory_space<vmem>>, vector<8x32xf32>
      tpu.vector_store %arg6[%c0_13, %c0_14], %14 {strides = array<i32>} : memref<8x32xf32, #tpu.memory_space<vmem>>, vector<8x32xf32>,
    } else {
    }
    return
  }
  func.func @transform_0(%arg0: i32, %arg1: i32, %arg2: i32) -> (i32, i32) {
    %c0_i32 = arith.constant 0 : i32
    return %arg0, %arg2 : i32, i32
  }
  func.func @transform_1(%arg0: i32, %arg1: i32, %arg2: i32) -> (i32, i32) {
    %c0_i32 = arith.constant 0 : i32
    return %arg1, %arg2 : i32, i32
  }
  func.func @transform_2(%arg0: i32, %arg1: i32, %arg2: i32) -> (i32, i32) {
    %c0_i32 = arith.constant 0 : i32
    %c0_i32_0 = arith.constant 0 : i32
    return %c0_i32, %arg1 : i32, i32
  }
  func.func @transform_3(%arg0: i32, %arg1: i32, %arg2: i32) -> (i32, i32) {
    %c0_i32 = arith.constant 0 : i32
    return %arg0, %arg1 : i32, i32
  }
}

</mosaic_0001>

<bundles_post_ra>
// kernel: residual_block.1
= control target key start
LH: loop header
LB: loop body
LE: loop exit
PB: predicated region body
PF: predicated region fallthrough
CT: control target
= control target key end

     0   :  { %8 = vsyncpa [#allocation3], 0  ;;  %s362_s0 = inlined_call_operand.hbm [shape: f32[8,32], index: 0, kind: input, shape index: {}]   ;;  %s363_s1 = inlined_call_operand.hbm [shape: f32[32,32], index: 1, kind: input, shape index: {}]   ;;  %s364_s2 = inlined_call_operand.vmem [shape: f32[1,32], index: 2, kind: input, shape index: {}]   ;;  %s365_s3 = inlined_call_operand.hbm [shape: f32[8,32], index: 3, kind: output, shape index: {}]  }
   0x1   :  { %9 = vsyncpa [#allocation6], 0 }
   0x2   :  { %10 = vsyncpa [#allocation4], 0  ;;  %s282_s12 = smov [#allocation2]   ;;  %s283_s14 = smov [#allocation5]  }
   0x3   :  { %s17_s13 = sshll.u32 %s282_s12, 4  ;;  %s26_s15 = sshll.u32 %s283_s14, 4  ;;  %s18_s13 = int_to_ptr.vmem [resolvable:$true] %s17_s13  ;;  %s310_s15 = int_to_ptr.vmem [resolvable:$true] %s26_s15 }
   0x4   :  { %s210_s18 = scalar_lea.hbm %s362_s0, 128 }
   0x5   :  { %p211_p0 = scmp.ne.s32.totalorder %s362_s0, %s210_s18  ;;  %p214_p1 = scmp.lt.u32.totalorder %s210_s18, %s362_s0 }
   0x7   :  { %p216_p2 = pnand %p214_p1, %p211_p0 }
   0x9   :  { %219 = shalt.err (!%p216_p2)
}
   0xa   :  { %s220_s23 = scalar_lea.vmem %s18_s13, 128  ;;  %p225_p4 = scmp.lt.s32.totalorder %s18_s13, %s18_s13 }
   0xb   :  { %p221_p3 = scmp.ne.s32.totalorder %s18_s13, %s220_s23  ;;  %p226_p5 = scmp.lt.s32.totalorder %s220_s23, %s220_s23 }
   0xd   :  { %p227_p6 = por %p226_p5, %p225_p4 }
   0xf   :  { %p228_p7 = pnand %p227_p6, %p221_p3 }
  0x11   :  { %231 = shalt.err (!%p228_p7)
}
  0x12   :  { %20 = dma.hbm_to_vmem [thread:$0]  %s362_s0, 128, %s18_s13, [#allocation3]  }
  0x13   :  { %s232_s28 = scalar_lea.hbm %s363_s1, 512 }
  0x14   :  { %p233_p8 = scmp.ne.s32.totalorder %s363_s1, %s232_s28  ;;  %p236_p9 = scmp.lt.u32.totalorder %s232_s28, %s363_s1 }
  0x16   :  { %p238_p10 = pnand %p236_p9, %p233_p8 }
  0x18   :  { %241 = shalt.err (!%p238_p10)
}
  0x19   :  { %s242_s6 = scalar_lea.vmem %s310_s15, 512  ;;  %p247_p12 = scmp.lt.s32.totalorder %s310_s15, %s310_s15 }
  0x1a   :  { %p243_p11 = scmp.ne.s32.totalorder %s310_s15, %s242_s6  ;;  %p248_p13 = scmp.lt.s32.totalorder %s242_s6, %s242_s6 }
  0x1c   :  { %p249_p0 = por %p248_p13, %p247_p12 }
  0x1e   :  { %p250_p1 = pnand %p249_p0, %p243_p11 }
  0x20   :  { %253 = shalt.err (!%p250_p1)
}
  0x21   :  { %s284_s0 = smov 128   ;;  %s285_s7 = smov 8  }
  0x22   :  { %32 = dma.hbm_to_vmem [thread:$0]  %s363_s1, 512, %s310_s15, [#allocation6], %s284_s0, %s284_s0, %s285_s7  }
  0x23   :  { %276 = dma.done.wait [#allocation3], 128  }
  0x24   :  { %277 = vsyncadd [#allocation3], 4294967168 }
  0x25   :  { %278 = dma.done.wait [#allocation6], 512  }
  0x26   :  { %279 = vsyncadd [#allocation6], 4294966784  ;;  %v286_v0 = vmov 0.0|0.0   ;;  %vm287_vm0 = vmmov 0   ;;  %v288_v1 = vmov 0.0   ;;  %vm52_vm1 = vcmask 261120  }
  0x27   :  { %194 = vmatprep.subr.bf16.mxu0 %v286_v0  ;;  %191 = vmatprep.mubr.msk.f32.mxu0 %vm287_vm0, %v288_v1  ;;  %v56_v2 = vld [vmem:[#allocation5] sm:$0xff]  ;;  %v57_v3 = vld [vmem:[#allocation5 + $0x8] sm:$0xff]  ;;  %vm196_vm2 = vmpackc.low %vm52_vm1, %vm52_vm1  ;;  %s289_s1 = smov [#allocation7]  }
  0x28   :  { %v195_v4 = vpack.c.bf16 %v57_v3, %v56_v2  ;;  %v172_v5 = vld [vmem:[%s364_s2] ss:$0 sm:$0xff]  ;;  %v58_v6 = vld [vmem:[#allocation5 + $0x10] sm:$0xff]  ;;  %s162_s12 = sshll.u32 %s289_s1, 4  ;;  %s163_s12 = int_to_ptr.vmem [resolvable:$true] %s162_s12 }
  0x29   :  { %53 = vst.msk [vmem:[#allocation7] sm:$0xff] %vm52_vm1, %v172_v5  ;;  %v59_v7 = vld [vmem:[#allocation5 + $0x18] sm:$0xff]  ;;  %s254_s2 = scalar_lea.vmem %s163_s12, 128  ;;  %p259_p3 = scmp.lt.s32.totalorder %s163_s12, %s163_s12 }
  0x2a   :  { %197 = vmatpush3.bf16.xpose.msk.msra.mxu0 %vm196_vm2, %v195_v4  ;;  %v199_v8 = vpack.c.bf16 %v59_v7, %v58_v6  ;;  %v55_v9 = vld [vmem:[#allocation2] sm:$0xff]  ;;  %p255_p2 = scmp.ne.s32.totalorder %s163_s12, %s254_s2  ;;  %p260_p4 = scmp.lt.s32.totalorder %s254_s2, %s254_s2 }
  0x2b   :  { %198 = vmatprep.subr.bf16.mxu0 %v286_v0 }
  0x2c   :  { %p261_p5 = por %p260_p4, %p259_p3 }
  0x2e   :  { %p262_p6 = pnand %p261_p5, %p255_p2 }
  0x30   :  { %v54_v10 = vld [vmem:[#allocation7] sm:$0xff] }
  0x32   :  { %201 = vmatpush3.bf16.xpose.msk.msra.mxu0 %vm196_vm2, %v199_v8 }
  0x39   :  { %192 = vmatmul.mubr.msk.f32.vlgmr.msra.gmra.mrb[0].mxu0 %vm52_vm1, %v55_v9 }
 0x10c   :  { %v142_v11 = vpop.f32.mrb[0].mxu0 }
 0x10d   :  { %v146_v12 = vadd.f32 %v142_v11, %v54_v10  ;;  %v193_v13 = vpop.f32.mrb[1].mxu0 }
 0x10f   :  { %147 = vst.msk [vmem:[#allocation7] sm:$0xff] %vm52_vm1, %v146_v12 }
 0x116   :  { %v152_v14 = vld [vmem:[#allocation7] sm:$0xff] }
 0x117   :  { %v154_v15 = vadd.f32 %v152_v14, %v55_v9 }
 0x119   :  { %155 = vst.msk [vmem:[#allocation7] sm:$0xff] %vm52_vm1, %v154_v15 }
 0x11a   :  { %265 = shalt.err (!%p262_p6)
}
 0x11b   :  { %s266_s15 = scalar_lea.hbm %s365_s3, 128 }
 0x11c   :  { %p267_p7 = scmp.ne.s32.totalorder %s365_s3, %s266_s15  ;;  %p270_p8 = scmp.lt.u32.totalorder %s266_s15, %s365_s3 }
 0x11e   :  { %p272_p9 = pnand %p270_p8, %p267_p7 }
 0x120   :  { %275 = shalt.err (!%p272_p9)
}
 0x121   :  { %165 = dma.vmem_to_hbm [thread:$0]  %s163_s12, 128, %s365_s3, [#allocation4]  }
 0x122   :  { %280 = dma.done.wait [#allocation4], 128  }
 0x123   :  { %281 = vsyncadd [#allocation4], 4294967168 }
 0x124   :  { %169 = vsyncpa [#allocation3], 1 }
 0x125   :  { %170 = vsyncpa [#allocation6], 1 }
 0x126   :  { %171 = vsyncpa [#allocation4], 1 }

</bundles_post_ra>
